<compile_context>
chip_gen: v7x
topology: tpu7x:2x2x1
jax: 0.10.0
libtpu: 0.0.40
codegen_flags: <defaults>
</compile_context>

<pallas_src>
import functools

import numpy as np
import jax
import jax.numpy as jnp
from jax.experimental import pallas as pl
from jax.experimental.pallas import tpu as pltpu


def _pick_tile(n, cap):
    """Largest multiple-of-8 tile <= cap that divides n (else the full dim)."""
    cap = min(n, cap)
    for t in range(cap - cap % 8, 0, -8):
        if n % t == 0:
            return t
    return n


# ----------------------------------------------------------------------------
# Kernel 1: matmul + bias  (1x1 projection conv), tiled over rows for pipelining
# ----------------------------------------------------------------------------
def _matmul_bias_kernel(x_ref, w_ref, b_ref, o_ref):
    acc = jnp.dot(x_ref[...].astype(jnp.bfloat16), w_ref[...],
                  preferred_element_type=jnp.float32)
    o_ref[...] = (acc + b_ref[...]).astype(o_ref.dtype)


def matmul_bias(x, w, b):
    M, K = x.shape
    N = w.shape[1]
    TM = _pick_tile(M, 512)
    return pl.pallas_call(
        _matmul_bias_kernel,
        out_shape=jax.ShapeDtypeStruct((M, N), jnp.float32),
        grid=(M // TM,),
        in_specs=[
            pl.BlockSpec((TM, K), lambda i: (i, 0)),
            pl.BlockSpec((K, N), lambda i: (0, 0)),
            pl.BlockSpec((1, N), lambda i: (0, 0)),
        ],
        out_specs=pl.BlockSpec((TM, N), lambda i: (i, 0)),
        compiler_params=pltpu.CompilerParams(dimension_semantics=("parallel",)),
    )(x, w, b.reshape(1, N))


# ----------------------------------------------------------------------------
# Kernel 2: fused [bilinear 2x upsample  +  concat  +  DoubleConv] per batch.
# Upsample (align_corners=True) is two wide MXU matmuls; the concat is folded
# into split conv-1 weights; 3x3 taps come from an H/W zero-padded VMEM
# scratch; the intermediate conv-1 activation stays in VMEM.
# ----------------------------------------------------------------------------
def _make_upsample_matrix(n_in):
    n_out = 2 * n_in
    if n_in == 1:
        return np.ones((n_out, 1), np.float32)
    src = np.arange(n_out, dtype=np.float64) * (n_in - 1) / (n_out - 1)
    i0 = np.clip(np.floor(src).astype(np.int64), 0, n_in - 1)
    i1 = np.clip(i0 + 1, 0, n_in - 1)
    w1 = src - i0
    w0 = 1.0 - w1
    U = np.zeros((n_out, n_in), np.float64)
    np.add.at(U, (np.arange(n_out), i0), w0)
    np.add.at(U, (np.arange(n_out), i1), w1)
    return U.astype(np.float32)


def _up_dconv_kernel(enc_ref, xs_ref, uh_ref, uwT_ref,
                     w1e_ref, w1u_ref, s1_ref, sh1_ref,
                     w2_ref, s2_ref, sh2_ref,
                     o_ref, zp_ref,
                     *, Hs, Ws, Ho, Wo, C, Cout):
    f32 = jnp.float32
    bf16 = jnp.bfloat16

    # ---- bilinear 2x upsample of xs: (Hs, Ws, C) -> (Ho, Wo, C) ------------
    xs = xs_ref[0].astype(f32)                                   # (Hs, Ws, C)
    xt = jnp.swapaxes(xs, 1, 2).reshape(Hs * C, Ws)              # (Hs*C, Ws)
    tw = jnp.dot(xt, uwT_ref[...], preferred_element_type=f32)   # (Hs*C, Wo)
    th = tw.reshape(Hs, C, Wo).reshape(Hs, C * Wo)               # (Hs, C*Wo)
    u = jnp.dot(uh_ref[...], th, preferred_element_type=f32)     # (Ho, C*Wo)
    up = jnp.swapaxes(u.reshape(Ho, C, Wo), 1, 2)                # (Ho, Wo, C)

    # ---- 3x3 conv taps from the zero-padded scratch ------------------------
    def conv_taps(w_ref):
        acc = jnp.zeros((Ho * Wo, Cout), f32)
        for dx in range(3):
            zs = zp_ref[:, dx:dx + Wo, :].astype(bf16)           # (Ho+2, Wo, C)
            for dy in range(3):
                patch = zs[dy:dy + Ho].reshape(Ho * Wo, C)
                acc = acc + jnp.dot(patch, w_ref[dy * 3 + dx],
                                    preferred_element_type=f32)
        return acc

    # conv1(concat([enc, up])) == conv(enc, w1_enc) + conv(up, w1_up)
    zp_ref[...] = jnp.zeros_like(zp_ref)
    zp_ref[1:Ho + 1, 1:Wo + 1, :] = enc_ref[0].astype(f32)
    acc = conv_taps(w1e_ref)
    zp_ref[1:Ho + 1, 1:Wo + 1, :] = up
    acc = acc + conv_taps(w1u_ref)
    y1 = jnp.maximum(acc * s1_ref[...] + sh1_ref[...], 0.0)      # BN(eval)+ReLU

    # conv2 (input channels == Cout == C for this module)
    zp_ref[1:Ho + 1, 1:Wo + 1, :] = y1.reshape(Ho, Wo, Cout)
    acc2 = conv_taps(w2_ref)
    y2 = jnp.maximum(acc2 * s2_ref[...] + sh2_ref[...], 0.0)
    o_ref[0] = y2.reshape(Ho, Wo, Cout).astype(o_ref.dtype)


def up_concat_double_conv(enc_nhwc, xs_nhwc, p):
    """enc: (B, 2H, 2W, td) NHWC; xs: (B, H, W, td) NHWC -> (B, 2H, 2W, td)."""
    B, Ho, Wo, C = enc_nhwc.shape
    _, Hs, Ws, _ = xs_nhwc.shape
    Cout = p["w2"].shape[-1]
    assert Ho == 2 * Hs and Wo == 2 * Ws and C == Cout

    uh = jnp.asarray(_make_upsample_matrix(Hs))          # (Ho, Hs)
    uwT = jnp.asarray(_make_upsample_matrix(Ws)).T       # (Ws, Wo)
    kernel = functools.partial(_up_dconv_kernel, Hs=Hs, Ws=Ws, Ho=Ho, Wo=Wo,
                               C=C, Cout=Cout)
    return pl.pallas_call(
        kernel,
        out_shape=jax.ShapeDtypeStruct((B, Ho, Wo, Cout), jnp.float32),
        grid=(B,),
        in_specs=[
            pl.BlockSpec((1, Ho, Wo, C), lambda b: (b, 0, 0, 0)),
            pl.BlockSpec((1, Hs, Ws, C), lambda b: (b, 0, 0, 0)),
            pl.BlockSpec((Ho, Hs), lambda b: (0, 0)),
            pl.BlockSpec((Ws, Wo), lambda b: (0, 0)),
            pl.BlockSpec((9, C, Cout), lambda b: (0, 0, 0)),
            pl.BlockSpec((9, C, Cout), lambda b: (0, 0, 0)),
            pl.BlockSpec((1, Cout), lambda b: (0, 0)),
            pl.BlockSpec((1, Cout), lambda b: (0, 0)),
            pl.BlockSpec((9, Cout, Cout), lambda b: (0, 0, 0)),
            pl.BlockSpec((1, Cout), lambda b: (0, 0)),
            pl.BlockSpec((1, Cout), lambda b: (0, 0)),
        ],
        out_specs=pl.BlockSpec((1, Ho, Wo, Cout), lambda b: (b, 0, 0, 0)),
        scratch_shapes=[pltpu.VMEM((Ho + 2, Wo + 2, C), jnp.float32)],
        compiler_params=pltpu.CompilerParams(dimension_semantics=("parallel",)),
    )(enc_nhwc, xs_nhwc, uh, uwT,
      p["w1e"], p["w1u"], p["scale1"].reshape(1, Cout), p["shift1"].reshape(1, Cout),
      p["w2"], p["scale2"].reshape(1, Cout), p["shift2"].reshape(1, Cout))


# ----------------------------------------------------------------------------
# Kernel 3a: LayerNorm + q/k/v projections, token-tiled.
# ----------------------------------------------------------------------------
def _ln_qkv_kernel(x_ref, g_ref, b_ref, wq_ref, wk_ref, wv_ref,
                   q_ref, k_ref, v_ref):
    x = x_ref[0].astype(jnp.float32)                          # (TT, C)
    mu = jnp.mean(x, axis=-1, keepdims=True)
    var = jnp.mean(jnp.square(x - mu), axis=-1, keepdims=True)
    xn = (x - mu) * jax.lax.rsqrt(var + 1e-5) * g_ref[...] + b_ref[...]
    xb = xn.astype(jnp.bfloat16)
    q_ref[0] = jnp.dot(xb, wq_ref[...], preferred_element_type=jnp.float32
                       ).astype(q_ref.dtype)
    k_ref[0] = jnp.dot(xb, wk_ref[...], preferred_element_type=jnp.float32
                       ).astype(k_ref.dtype)
    v_ref[0] = jnp.dot(xb, wv_ref[...], preferred_element_type=jnp.float32
                       ).astype(v_ref.dtype)


# ----------------------------------------------------------------------------
# Kernel 3b: flash attention (online softmax over kv tiles) + fused epilogue
#            (proj, v-residual, LN2, MLP) on the last kv step.
# ----------------------------------------------------------------------------
def _flash_attn_mlp_kernel(q_ref, k_ref, v_ref, vq_ref,
                           wp_ref, bp_ref, g2_ref, b2_ref,
                           w1_ref, bm1_ref, w2_ref, bm2_ref,
                           o_ref, m_sc, l_sc, acc_sc, *, scale):
    ki = pl.program_id(2)

    @pl.when(ki == 0)
    def _():
        m_sc[...] = jnp.full_like(m_sc, -jnp.inf)
        l_sc[...] = jnp.zeros_like(l_sc)
        acc_sc[...] = jnp.zeros_like(acc_sc)

    q = q_ref[0].astype(jnp.bfloat16)
    k = k_ref[0].astype(jnp.bfloat16)
    v = v_ref[0].astype(jnp.bfloat16)

    # q @ k^T without materializing a transpose (contract last dims).
    s = jax.lax.dot_general(q, k, (((1,), (1,)), ((), ())),
                            preferred_element_type=jnp.float32) * scale
    m_prev = m_sc[...]
    m_new = jnp.maximum(m_prev, jnp.max(s, axis=-1, keepdims=True))
    alpha = jnp.exp(m_prev - m_new)
    p = jnp.exp(s - m_new)
    l_sc[...] = alpha * l_sc[...] + jnp.sum(p, axis=-1, keepdims=True)
    acc_sc[...] = alpha * acc_sc[...] + jnp.dot(
        p.astype(jnp.bfloat16), v, preferred_element_type=jnp.float32)
    m_sc[...] = m_new

    @pl.when(ki == pl.num_programs(2) - 1)
    def _():
        attn = acc_sc[...] * pl.reciprocal(l_sc[...], approx=True)   # (TQ, C)
        x1 = (vq_ref[0].astype(jnp.float32)
              + jnp.dot(attn.astype(jnp.bfloat16), wp_ref[...],
                        preferred_element_type=jnp.float32) + bp_ref[...])
        mu = jnp.mean(x1, axis=-1, keepdims=True)
        var = jnp.mean(jnp.square(x1 - mu), axis=-1, keepdims=True)
        x1n = (x1 - mu) * jax.lax.rsqrt(var + 1e-5) * g2_ref[...] + b2_ref[...]
        h = jnp.dot(x1n.astype(jnp.bfloat16), w1_ref[...],
                    preferred_element_type=jnp.float32) + bm1_ref[...]
        h = jax.nn.gelu(h, approximate=True)
        mlp = jnp.dot(h.astype(jnp.bfloat16), w2_ref[...],
                      preferred_element_type=jnp.float32) + bm2_ref[...]
        o_ref[0] = (x1 + mlp).astype(o_ref.dtype)


def spatial_transformer(x, p, scale):
    B, N, C = x.shape

    # ---- stage A: LN1 + qkv (token-tiled, fully parallel) -------------------
    TT = _pick_tile(N, 256)
    q, k, v = pl.pallas_call(
        _ln_qkv_kernel,
        out_shape=[jax.ShapeDtypeStruct((B, N, C), jnp.float32)] * 3,
        grid=(B, N // TT),
        in_specs=[
            pl.BlockSpec((1, TT, C), lambda b, t: (b, t, 0)),
            pl.BlockSpec((1, C), lambda b, t: (0, 0)),
            pl.BlockSpec((1, C), lambda b, t: (0, 0)),
            pl.BlockSpec((C, C), lambda b, t: (0, 0)),
            pl.BlockSpec((C, C), lambda b, t: (0, 0)),
            pl.BlockSpec((C, C), lambda b, t: (0, 0)),
        ],
        out_specs=[pl.BlockSpec((1, TT, C), lambda b, t: (b, t, 0))] * 3,
        compiler_params=pltpu.CompilerParams(
            dimension_semantics=("parallel", "parallel")),
    )(x, p["g1"].reshape(1, C), p["b1"].reshape(1, C),
      p["wq"], p["wk"], p["wv"])

    # ---- stage B: flash attention + fused proj/LN2/MLP epilogue -------------
    TQ = _pick_tile(N, 128)
    TK = _pick_tile(N, 128)
    kernel = functools.partial(_flash_attn_mlp_kernel, scale=scale)

    def wspec(shape):
        return pl.BlockSpec(shape, lambda b, qi, ki, _s=shape: (0,) * len(_s))

    return pl.pallas_call(
        kernel,
        out_shape=jax.ShapeDtypeStruct((B, N, C), jnp.float32),
        grid=(B, N // TQ, N // TK),
        in_specs=[
            pl.BlockSpec((1, TQ, C), lambda b, qi, ki: (b, qi, 0)),   # q
            pl.BlockSpec((1, TK, C), lambda b, qi, ki: (b, ki, 0)),   # k
            pl.BlockSpec((1, TK, C), lambda b, qi, ki: (b, ki, 0)),   # v (kv side)
            pl.BlockSpec((1, TQ, C), lambda b, qi, ki: (b, qi, 0)),   # v (residual)
            wspec((C, C)), wspec((1, C)),                             # proj
            wspec((1, C)), wspec((1, C)),                             # LN2
            wspec((C, C)), wspec((1, C)),                             # mlp fc1
            wspec((C, C)), wspec((1, C)),                             # mlp fc2
        ],
        out_specs=pl.BlockSpec((1, TQ, C), lambda b, qi, ki: (b, qi, 0)),
        scratch_shapes=[pltpu.VMEM((TQ, 1), jnp.float32),
                        pltpu.VMEM((TQ, 1), jnp.float32),
                        pltpu.VMEM((TQ, C), jnp.float32)],
        compiler_params=pltpu.CompilerParams(
            dimension_semantics=("parallel", "parallel", "arbitrary")),
    )(q, k, v, v,
      p["wproj"], p["bproj"].reshape(1, C),
      p["g2"].reshape(1, C), p["b2"].reshape(1, C),
      p["mw1"], p["mb1"].reshape(1, C),
      p["mw2"], p["mb2"].reshape(1, C))


# ----------------------------------------------------------------------------
# FTN_decoder forward
# ----------------------------------------------------------------------------
def ftn_decoder_forward(params, x, encoder_list):
    """x: (B, embed_dim, H, W) NCHW. Returns (B, token_dim, 4H, 4W) NCHW."""
    B, Cemb, H, W = x.shape
    td = params["token_dim"]

    # Single layout change at the NCHW boundary; everything else stays NHWC.
    x_nhwc = jnp.transpose(x, (0, 2, 3, 1))
    enc1 = jnp.transpose(encoder_list[-1], (0, 2, 3, 1))   # (B, 2H, 2W, td)
    enc2 = jnp.transpose(encoder_list[-2], (0, 2, 3, 1))   # (B, 4H, 4W, td)

    # proj: 1x1 conv == per-pixel matmul
    xp = matmul_bias(x_nhwc.reshape(B * H * W, Cemb),
                     params["proj_w"], params["proj_b"])
    xp = xp.reshape(B, H, W, td)

    # stage 1
    c1 = up_concat_double_conv(enc1, xp, params["conv1"])          # (B,2H,2W,td)
    a1 = spatial_transformer(c1.reshape(B, (2 * H) * (2 * W), td),
                             params["attn1"], params["scale"])
    x1 = a1.reshape(B, 2 * H, 2 * W, td)

    # stage 2
    c2 = up_concat_double_conv(enc2, x1, params["conv2"])          # (B,4H,4W,td)
    a2 = spatial_transformer(c2.reshape(B, (4 * H) * (4 * W), td),
                             params["attn2"], params["scale"])
    out = a2.reshape(B, 4 * H, 4 * W, td)
    return jnp.transpose(out, (0, 3, 1, 2))                        # back to NCHW


# ----------------------------------------------------------------------------
# Deterministic parameter init (synthetic; no checkpoint loading)
# ----------------------------------------------------------------------------
def init_params(key, embed_dim, token_dim):
    keys = iter(jax.random.split(key, 64))
    eps = 1e-5
    bf16 = jnp.bfloat16

    def nrm(shape, s=0.05, dtype=jnp.float32):
        return (s * jax.random.normal(next(keys), shape, jnp.float32)).astype(dtype)

    def bn(c):
        gamma = nrm((c,)) + 1.0
        beta = nrm((c,))
        scale = gamma / jnp.sqrt(1.0 + eps)    # eval-mode BN: mean=0, var=1
        return scale, beta

    def dconv(c):
        # conv1 weight split along input channels into (encoder, upsampled) halves.
        w1e = nrm((9, c, c), dtype=bf16)
        w1u = nrm((9, c, c), dtype=bf16)
        b1 = nrm((c,))
        s1, bt1 = bn(c)
        w2 = nrm((9, c, c), dtype=bf16)
        b2 = nrm((c,))
        s2, bt2 = bn(c)
        return {"w1e": w1e, "w1u": w1u, "scale1": s1, "shift1": b1 * s1 + bt1,
                "w2": w2, "scale2": s2, "shift2": b2 * s2 + bt2}

    def attn(c):
        return {"wq": nrm((c, c), dtype=bf16), "wk": nrm((c, c), dtype=bf16),
                "wv": nrm((c, c), dtype=bf16),
                "wproj": nrm((c, c), dtype=bf16), "bproj": nrm((c,)),
                "g1": nrm((c,)) + 1.0, "b1": nrm((c,)),
                "g2": nrm((c,)) + 1.0, "b2": nrm((c,)),
                "mw1": nrm((c, c), dtype=bf16), "mb1": nrm((c,)),
                "mw2": nrm((c, c), dtype=bf16), "mb2": nrm((c,))}

    td = token_dim
    return {
        "token_dim": td,
        "proj_w": nrm((embed_dim, td), dtype=bf16), "proj_b": nrm((td,)),
        "conv1": dconv(td), "conv2": dconv(td),
        "attn1": attn(td), "attn2": attn(td),
        "scale": float((td // 2) ** -0.5),   # head_dim = dim // num_heads, dim = td//2
    }


if __name__ == "__main__":
    key = jax.random.PRNGKey(0)
    B, embed_dim, token_dim, H = 2, 32, 16, 4
    k1, k2, k3, kp = jax.random.split(key, 4)

    x = jax.random.normal(k1, (B, embed_dim, H, H), jnp.float32)
    enc_m2 = jax.random.normal(k2, (B, token_dim, 4 * H, 4 * H), jnp.float32)  # encoder_list[-2]
    enc_m1 = jax.random.normal(k3, (B, token_dim, 2 * H, 2 * H), jnp.float32)  # encoder_list[-1]
    encoder_list = [enc_m2, enc_m1]

    params = init_params(kp, embed_dim, token_dim)
    out = ftn_decoder_forward(params, x, encoder_list)
    out = jax.block_until_ready(out)

    assert out.shape == (B, token_dim, 4 * H, 4 * H), out.shape
    assert bool(jnp.all(jnp.isfinite(out)))
    print("KERNEL_OK")
</pallas_src>

<mosaic_0001>
module attributes {stable_mosaic.version = 11 : i64} {
  func.func @_matmul_bias_kernel(%arg0: i32, %arg1: memref<32x32xf32, #tpu.memory_space<vmem>>, %arg2: memref<32x16xbf16, #tpu.memory_space<vmem>>, %arg3: memref<1x16xf32, #tpu.memory_space<vmem>>, %arg4: memref<32x16xf32, #tpu.memory_space<vmem>>) attributes {dimension_semantics = [#tpu.dimension_semantics<parallel>], iteration_bounds = array<i64: 1>, scalar_prefetch = 0 : i64, scratch_operands = 0 : i64, tpu.core_type = #tpu.core_type<tc>, window_params = [{transform_indices = @transform_0, window_bounds = array<i64: 32, 32>}, {pipeline_mode = #tpu.pipeline_mode<synchronous>, transform_indices = @transform_1, window_bounds = array<i64: 32, 16>}, {pipeline_mode = #tpu.pipeline_mode<synchronous>, transform_indices = @transform_2, window_bounds = array<i64: 1, 16>}, {transform_indices = @transform_3, window_bounds = array<i64: 32, 16>}]} {
    %c0 = arith.constant 0 : index
    %c0_0 = arith.constant 0 : index
    %0 = vector.load %arg1[%c0, %c0_0] : memref<32x32xf32, #tpu.memory_space<vmem>>, vector<32x32xf32>
    %1 = arith.truncf %0 : vector<32x32xf32> to vector<32x32xbf16>
    %c0_1 = arith.constant 0 : index
    %c0_2 = arith.constant 0 : index
    %2 = vector.load %arg2[%c0_1, %c0_2] : memref<32x16xbf16, #tpu.memory_space<vmem>>, vector<32x16xbf16>
    %cst = arith.constant dense<0.000000e+00> : vector<32x16xf32>
    %3 = tpu.matmul %1, %2, %cst {dimension_numbers = #tpu.dot_dimension_numbers<[1], [0], [0], [1], [0, 0, 1, 1], [], []>} : vector<32x32xbf16>, vector<32x16xbf16>, vector<32x16xf32> -> vector<32x16xf32>
    %c0_3 = arith.constant 0 : index
    %c0_4 = arith.constant 0 : index
    %4 = vector.load %arg3[%c0_3, %c0_4] : memref<1x16xf32, #tpu.memory_space<vmem>>, vector<1x16xf32>
    %5 = vector.broadcast %4 : vector<1x16xf32> to vector<32x16xf32>
    %6 = arith.addf %3, %5 : vector<32x16xf32>
    %c0_5 = arith.constant 0 : index
    %c0_6 = arith.constant 0 : index
    %7 = vector.load %arg4[%c0_5, %c0_6] : memref<32x16xf32, #tpu.memory_space<vmem>>, vector<32x16xf32>
    tpu.vector_store %arg4[%c0_5, %c0_6], %6 {strides = array<i32>} : memref<32x16xf32, #tpu.memory_space<vmem>>, vector<32x16xf32>,
    return
  }
  func.func @transform_0(%arg0: i32) -> (i32, i32) {
    %c0_i32 = arith.constant 0 : i32
    %c0_i32_0 = arith.constant 0 : i32
    return %arg0, %c0_i32 : i32, i32
  }
  func.func @transform_1(%arg0: i32) -> (i32, i32) {
    %c0_i32 = arith.constant 0 : i32
    %c0_i32_0 = arith.constant 0 : i32
    %c0_i32_1 = arith.constant 0 : i32
    return %c0_i32, %c0_i32_0 : i32, i32
  }
  func.func @transform_2(%arg0: i32) -> (i32, i32) {
    %c0_i32 = arith.constant 0 : i32
    %c0_i32_0 = arith.constant 0 : i32
    %c0_i32_1 = arith.constant 0 : i32
    return %c0_i32, %c0_i32_0 : i32, i32
  }
  func.func @transform_3(%arg0: i32) -> (i32, i32) {
    %c0_i32 = arith.constant 0 : i32
    %c0_i32_0 = arith.constant 0 : i32
    return %arg0, %c0_i32 : i32, i32
  }
}

</mosaic_0001>

<bundles_post_ra>
// kernel: tpu_custom_call.1
= control target key start
LH: loop header
LB: loop body
LE: loop exit
PB: predicated region body
PF: predicated region fallthrough
CT: control target
= control target key end

     0   :  { %8 = vsyncpa [#allocation3], 0  ;;  %s170_s12 = smov [#allocation2]   ;;  %s226_s0 = inlined_call_operand.hbm [shape: f32[32,32], index: 0, kind: input, shape index: {}]   ;;  %s227_s1 = inlined_call_operand.vmem [shape: bf16[32,16], index: 1, kind: input, shape index: {}]   ;;  %s228_s2 = inlined_call_operand.vmem [shape: f32[1,16], index: 2, kind: input, shape index: {}]   ;;  %s229_s3 = inlined_call_operand.vmem [shape: f32[32,16], index: 3, kind: output, shape index: {}]  }
   0x1   :  { %s14_s13 = sshll.u32 %s170_s12, 4  ;;  %s146_s16 = scalar_lea.hbm %s226_s0, 512  ;;  %s15_s13 = int_to_ptr.vmem [resolvable:$true] %s14_s13 }
   0x2   :  { %p147_p0 = scmp.ne.s32.totalorder %s226_s0, %s146_s16  ;;  %p150_p1 = scmp.lt.u32.totalorder %s146_s16, %s226_s0 }
   0x4   :  { %p152_p2 = pnand %p150_p1, %p147_p0 }
   0x6   :  { %155 = shalt.err (!%p152_p2)
}
   0x7   :  { %s156_s21 = scalar_lea.vmem %s15_s13, 512  ;;  %p161_p4 = scmp.lt.s32.totalorder %s15_s13, %s15_s13 }
   0x8   :  { %p157_p3 = scmp.ne.s32.totalorder %s15_s13, %s156_s21  ;;  %p162_p5 = scmp.lt.s32.totalorder %s156_s21, %s156_s21 }
   0xa   :  { %p163_p6 = por %p162_p5, %p161_p4 }
   0xc   :  { %p164_p7 = pnand %p163_p6, %p157_p3 }
   0xe   :  { %167 = shalt.err (!%p164_p7)
}
   0xf   :  { %s171_s22 = smov 128   ;;  %s172_s23 = smov 8  }
  0x10   :  { %20 = dma.hbm_to_vmem [thread:$0]  %s226_s0, 512, %s15_s13, [#allocation3], %s171_s22, %s171_s22, %s172_s23  }
  0x11   :  { %168 = dma.done.wait [#allocation3], 512  }
  0x12   :  { %169 = vsyncadd [#allocation3], 4294966784  ;;  %v144_v0 = vld [vmem:[%s227_s1] sm:$0xff]   ;;  %v145_v1 = vld [vmem:[%s227_s1 + $0x8] sm:$0xff]   ;;  %vm58_vm0 = vcmask 261120   ;;  %vm114_vm1 = vcmask 130048  }
  0x13   :  { %133 = vmatprep.subr.bf16.mxu0 %v144_v0  ;;  %v29_v2 = vld [vmem:[#allocation2] sm:$0xff]  ;;  %v30_v3 = vld [vmem:[#allocation2 + $0x8] sm:$0xff]  ;;  %v31_v5 = vld [vmem:[#allocation2 + $0x10] sm:$0xff] }
  0x14   :  { %134 = vmatpush3.bf16.msra.mxu0 %v144_v0  ;;  %v33_v4 = vpack.c.bf16 %v30_v3, %v29_v2  ;;  %v32_v6 = vld [vmem:[#allocation2 + $0x18] sm:$0xff]  ;;  %v124_v8 = vld [vmem:[%s228_s2] ss:$0 sm:$0xff] }
  0x15   :  { %135 = vmatprep.subr.bf16.mxu0 %v145_v1  ;;  %v34_v7 = vpack.c.bf16 %v32_v6, %v31_v5 }
  0x16   :  { %137 = vmatprep.mubr.msk.bf16.mxu0 %vm58_vm0, %v33_v4 }
  0x18   :  { %136 = vmatpush3.bf16.msra.mxu0 %v145_v1 }
  0x1b   :  { %138 = vmatmul.mubr.msk.bf16.vlgmr.msra.gmra.mrb[0].mxu0 %vm58_vm0, %v34_v7 }
  0xee   :  { %v139_v9 = vpop.f32.mrb[0].mxu0 }
  0xef   :  { %v108_v10 = vadd.f32 %v139_v9, %v124_v8  ;;  %v99_v11 = vpop.f32.mrb[1].mxu0 }
  0xf0   :  { %v100_v12 = vadd.f32 %v124_v8, %v99_v11  ;;  %v140_v13 = vpop.f32.mrb[2].mxu0 }
  0xf1   :  { %117 = vst.msk [vmem:[%s229_s3 + $0x10] sm:$0xff] %vm114_vm1, %v108_v10  ;;  %v111_v14 = vadd.f32 %v140_v13, %v124_v8  ;;  %v102_v15 = vpop.f32.mrb[3].mxu0 }
  0xf2   :  { %115 = vst.msk [vmem:[%s229_s3] sm:$0xff] %vm114_vm1, %v100_v12  ;;  %v103_v16 = vadd.f32 %v124_v8, %v102_v15 }
  0xf3   :  { %118 = vst.msk [vmem:[%s229_s3 + $0x18] sm:$0xff] %vm114_vm1, %v111_v14 }
  0xf4   :  { %116 = vst.msk [vmem:[%s229_s3 + $0x8] sm:$0xff] %vm114_vm1, %v103_v16 }
  0xf5   :  { %123 = vsyncpa [#allocation3], 1 }

</bundles_post_ra>
